<compile_context>
chip_gen: v5e
topology: v5e:2x2
jax: 0.10.0
libtpu: 0.0.40
codegen_flags: <defaults>
</compile_context>

<pallas_src>
import functools

import jax
import jax.numpy as jnp
from jax.experimental import pallas as pl
from jax.experimental.pallas import tpu as pltpu


def _round_up(x, m):
    return (x + m - 1) // m * m


def _softplus(y):
    # torch.nn.functional.softplus (beta=1), numerically stable.
    return jnp.maximum(y, 0.0) + jnp.log1p(jnp.exp(-jnp.abs(y)))


def encoder_kernel(x_ref, rd_ref, cov_ref, ex_ref,
                   w1x_ref, w1r_ref, w1c_ref, w1e_ref, b1_ref,
                   w2_ref, b2_ref,
                   w3_ref, b3_ref,
                   out_ref, *, num_topics, num_covariates, num_extra_features):
    """Fused fc_stack (3 layers, BN folded) with in-kernel hstack/log and a single
    lane-dense packed output slab:
        out[:, :K]        = theta_loc (raw)
        out[:, K:2K]      = softplus(theta_scale logits)
        out[:, 2K]        = rd_loc (raw)
        out[:, 2K+1]      = softplus(rd_scale logit)
        out[:, 2K+2:128]  = zeros (padding)
    """
    x = x_ref[...]                              # (bm, nX)
    log_rd = jnp.log(rd_ref[...])               # (bm, 1)  -- EUP slot, ~free

    # ---- layer 1: fused hstack + Linear (BN scale folded into W) + shift + ReLU ----
    h = jnp.dot(x, w1x_ref[...], preferred_element_type=jnp.float32)
    h = h + log_rd * w1r_ref[...]               # (bm,1) * (1,d1) broadcast FMA
    cov = cov_ref[...]
    w1c = w1c_ref[...]
    for c in range(num_covariates):             # tiny static loop -> broadcast FMAs,
        h = h + cov[:, c:c + 1] * w1c[c:c + 1, :]   # avoids tiny-K matmuls
    ex = ex_ref[...]
    w1e = w1e_ref[...]
    for c in range(num_extra_features):
        h = h + ex[:, c:c + 1] * w1e[c:c + 1, :]
    h = h + b1_ref[...]
    h = jnp.maximum(h, 0.0)                     # Dropout = identity in eval

    # ---- layer 2: Linear (BN folded) + shift + ReLU ----
    h = jnp.dot(h, w2_ref[...], preferred_element_type=jnp.float32)
    h = h + b2_ref[...]
    h = jnp.maximum(h, 0.0)

    # ---- layer 3: Linear (BN folded) + shift, skip_nonlin=True ----
    y = jnp.dot(h, w3_ref[...], preferred_element_type=jnp.float32)
    y = y + b3_ref[...]                         # (bm, 128) zero-padded columns

    # Apply softplus only where the module does (theta_scale cols and rd_scale col).
    col = jax.lax.broadcasted_iota(jnp.int32, y.shape, 1)
    K = num_topics
    sp_mask = ((col >= K) & (col < 2 * K)) | (col == 2 * K + 1)
    out_ref[...] = jnp.where(sp_mask, _softplus(y), y)


# ----------------------------------------------------------------------------- params
def init_torch_params(key, layer_dims):
    """Deterministic synthetic torch-style params: Linear(W,b) + BatchNorm1d stats."""
    layers = []
    for din, dout in zip(layer_dims[:-1], layer_dims[1:]):
        key, k1, k2, k3, k4, k5, k6 = jax.random.split(key, 7)
        bound = 1.0 / float(din) ** 0.5
        W = jax.random.uniform(k1, (dout, din), jnp.float32, -bound, bound)
        b = jax.random.uniform(k2, (dout,), jnp.float32, -bound, bound)
        gamma = 1.0 + 0.1 * jax.random.normal(k3, (dout,), jnp.float32)
        beta = 0.1 * jax.random.normal(k4, (dout,), jnp.float32)
        mean = 0.1 * jax.random.normal(k5, (dout,), jnp.float32)
        var = jnp.abs(jax.random.normal(k6, (dout,), jnp.float32)) + 1.0
        layers.append((W, b, gamma, beta, mean, var))
    return layers


def prepare_kernel_params(layers, *, num_endog_features, num_covariates,
                          num_extra_features, out_pad, eps=1e-5):
    """Fold BN (running stats) into the weights, transpose to (in, out), split the
    first-layer weight by input block (X / log_rd / covariates / extra), and pad the
    last layer to `out_pad` lanes so the kernel's output is lane-dense."""
    folded = []
    for (W, b, gamma, beta, mean, var) in layers:
        s = gamma / jnp.sqrt(var + eps)                  # (dout,)
        Wf = (W * s[:, None]).T                          # (din, dout), BN scale folded
        shift = ((b - mean) * s + beta).reshape(1, -1)   # (1, dout)
        folded.append((Wf, shift))

    (w1, b1), (w2, b2), (w3, b3) = folded
    nX, nC, nE = num_endog_features, num_covariates, num_extra_features
    w1x = w1[:nX]                                        # (nX, d1)
    w1r = w1[nX:nX + 1]                                  # (1,  d1)
    w1c = w1[nX + 1:nX + 1 + nC]                         # (nC, d1)
    w1e = w1[nX + 1 + nC:nX + 1 + nC + nE]               # (nE, d1)

    d_out = w3.shape[1]
    pad = out_pad - d_out
    w3p = jnp.pad(w3, ((0, 0), (0, pad)))                # (d2, out_pad)
    b3p = jnp.pad(b3, ((0, 0), (0, pad)))                # (1,  out_pad)
    return (w1x, w1r, w1c, w1e, b1, w2, b2, w3p, b3p)


# ----------------------------------------------------------------------------- forward
@functools.partial(jax.jit, static_argnames=("num_topics", "bm"))
def expression_encoder_forward(X, read_depth, covariates, extra_features,
                               kparams, *, num_topics, bm=512):
    X = X.astype(jnp.float32)
    read_depth = read_depth.astype(jnp.float32)
    covariates = covariates.astype(jnp.float32)
    extra_features = extra_features.astype(jnp.float32)

    w1x, w1r, w1c, w1e, b1, w2, b2, w3p, b3p = kparams
    B = X.shape[0]
    nX, nC, nE = X.shape[1], covariates.shape[1], extra_features.shape[1]
    d1, d2, out_pad = w1x.shape[1], w2.shape[1], w3p.shape[1]

    # Batch tiling: tile of bm rows (multiple of 8), pad the batch so no rows are
    # dropped; padded read_depth rows use 1.0 so log() stays finite.
    bm = min(bm, _round_up(B, 8))
    B_pad = _round_up(B, bm)
    pad_rows = B_pad - B
    if pad_rows:
        X = jnp.pad(X, ((0, pad_rows), (0, 0)))
        read_depth = jnp.pad(read_depth, ((0, pad_rows), (0, 0)), constant_values=1.0)
        covariates = jnp.pad(covariates, ((0, pad_rows), (0, 0)))
        extra_features = jnp.pad(extra_features, ((0, pad_rows), (0, 0)))

    row_map = lambda i: (i, 0)
    full_map = lambda i: (0, 0)

    weight_elems = (w1x.size + w1r.size + w1c.size + w1e.size + b1.size
                    + w2.size + b2.size + w3p.size + b3p.size)
    flops = 2 * B_pad * (nX * d1 + (1 + nC + nE) * d1 + d1 * d2 + d2 * out_pad)
    transcendentals = B_pad * (2 * out_pad + 1)          # softplus exp/log1p + log(rd)
    bytes_accessed = 4 * (B_pad * (nX + 1 + nC + nE) + B_pad * out_pad + weight_elems)

    kernel = functools.partial(encoder_kernel, num_topics=num_topics,
                               num_covariates=nC, num_extra_features=nE)

    slab = pl.pallas_call(
        kernel,
        out_shape=jax.ShapeDtypeStruct((B_pad, out_pad), jnp.float32),
        grid=(B_pad // bm,),
        in_specs=[
            pl.BlockSpec((bm, nX), row_map),
            pl.BlockSpec((bm, 1), row_map),
            pl.BlockSpec((bm, nC), row_map),
            pl.BlockSpec((bm, nE), row_map),
            pl.BlockSpec(w1x.shape, full_map),
            pl.BlockSpec(w1r.shape, full_map),
            pl.BlockSpec(w1c.shape, full_map),
            pl.BlockSpec(w1e.shape, full_map),
            pl.BlockSpec(b1.shape, full_map),
            pl.BlockSpec(w2.shape, full_map),
            pl.BlockSpec(b2.shape, full_map),
            pl.BlockSpec(w3p.shape, full_map),
            pl.BlockSpec(b3p.shape, full_map),
        ],
        out_specs=pl.BlockSpec((bm, out_pad), row_map),
        compiler_params=pltpu.CompilerParams(
            dimension_semantics=("parallel",)),
        cost_estimate=pl.CostEstimate(
            flops=int(flops), transcendentals=int(transcendentals),
            bytes_accessed=int(bytes_accessed)),
    )(X, read_depth, covariates, extra_features,
      w1x, w1r, w1c, w1e, b1, w2, b2, w3p, b3p)

    slab = slab[:B]
    K = num_topics
    theta_loc = slab[:, :K]
    theta_scale = slab[:, K:2 * K]                  # softplus already applied in kernel
    rd_loc = slab[:, 2 * K:2 * K + 1]
    rd_scale = slab[:, 2 * K + 1:2 * K + 2]         # softplus already applied in kernel
    return theta_loc, theta_scale, rd_loc, rd_scale


# ----------------------------------------------------------------------------- reference
def reference_forward(X, read_depth, covariates, extra_features, layers,
                      num_topics, eps=1e-5):
    """Plain-JAX reference using UNfolded Linear + BatchNorm1d(eval) params."""
    x = jnp.concatenate([X, jnp.log(read_depth), covariates, extra_features], axis=1)
    n = len(layers)
    for i, (W, b, gamma, beta, mean, var) in enumerate(layers):
        x = x @ W.T + b
        x = (x - mean) / jnp.sqrt(var + eps) * gamma + beta
        if i < n - 1:
            x = jnp.maximum(x, 0.0)
    K = num_topics
    return (x[:, :K],
            jax.nn.softplus(x[:, K:2 * K]),
            x[:, 2 * K:2 * K + 1],
            jax.nn.softplus(x[:, 2 * K + 1:2 * K + 2]))


if __name__ == "__main__":
    # Module hyperparameters (small).
    num_endog_features = 16
    num_covariates = 2
    num_extra_features = 1
    num_topics = 4
    hidden = 32
    num_layers = 3            # kernel hot path is specialized to 3 fc layers
    embedding_size = hidden

    in_dim = num_endog_features + 1 + num_covariates + num_extra_features   # 20
    out_dim = 2 * num_topics + 2                                            # 10
    layer_dims = [in_dim, embedding_size] + [hidden] * (num_layers - 2) + [out_dim]
    out_pad = max(128, _round_up(out_dim, 128))                             # lane-dense

    key = jax.random.PRNGKey(0)
    kp, kx, kr, kc, ke = jax.random.split(key, 5)

    layers = init_torch_params(kp, layer_dims)
    kparams = prepare_kernel_params(
        layers, num_endog_features=num_endog_features,
        num_covariates=num_covariates, num_extra_features=num_extra_features,
        out_pad=out_pad)

    B = 10     # deliberately NOT a multiple of the tile -> exercises pad + 2 grid steps
    X = jax.random.normal(kx, (B, num_endog_features), jnp.float32)
    read_depth = jax.random.uniform(kr, (B, 1), jnp.float32, 1.0, 1000.0)
    covariates = jax.random.normal(kc, (B, num_covariates), jnp.float32)
    extra_features = jax.random.normal(ke, (B, num_extra_features), jnp.float32)

    outs = expression_encoder_forward(
        X, read_depth, covariates, extra_features, kparams,
        num_topics=num_topics, bm=8)
    outs = jax.block_until_ready(outs)

    refs = reference_forward(X, read_depth, covariates, extra_features,
                             layers, num_topics)
    for got, want in zip(outs, refs):
        assert got.shape == want.shape, (got.shape, want.shape)
        if not jnp.allclose(got, want, atol=1e-4, rtol=1e-4):
            raise AssertionError("Pallas kernel output mismatch vs JAX reference")

    print("KERNEL_OK")
</pallas_src>

<mosaic_0001>
module attributes {stable_mosaic.version = 11 : i64} {
  func.func @encoder_kernel(%arg0: i32, %arg1: memref<8x16xf32, #tpu.memory_space<vmem>>, %arg2: memref<8x1xf32, #tpu.memory_space<vmem>>, %arg3: memref<8x2xf32, #tpu.memory_space<vmem>>, %arg4: memref<8x1xf32, #tpu.memory_space<vmem>>, %arg5: memref<16x32xf32, #tpu.memory_space<vmem>>, %arg6: memref<1x32xf32, #tpu.memory_space<vmem>>, %arg7: memref<2x32xf32, #tpu.memory_space<vmem>>, %arg8: memref<1x32xf32, #tpu.memory_space<vmem>>, %arg9: memref<1x32xf32, #tpu.memory_space<vmem>>, %arg10: memref<32x32xf32, #tpu.memory_space<vmem>>, %arg11: memref<1x32xf32, #tpu.memory_space<vmem>>, %arg12: memref<32x128xf32, #tpu.memory_space<vmem>>, %arg13: memref<1x128xf32, #tpu.memory_space<vmem>>, %arg14: memref<8x128xf32, #tpu.memory_space<vmem>>) attributes {dimension_semantics = [#tpu.dimension_semantics<parallel>], iteration_bounds = array<i64: 2>, scalar_prefetch = 0 : i64, scratch_operands = 0 : i64, tpu.core_type = #tpu.core_type<tc>, window_params = [{transform_indices = @transform_0, window_bounds = array<i64: 8, 16>}, {transform_indices = @transform_1, window_bounds = array<i64: 8, 1>}, {transform_indices = @transform_2, window_bounds = array<i64: 8, 2>}, {transform_indices = @transform_3, window_bounds = array<i64: 8, 1>}, {pipeline_mode = #tpu.pipeline_mode<synchronous>, transform_indices = @transform_4, window_bounds = array<i64: 16, 32>}, {pipeline_mode = #tpu.pipeline_mode<synchronous>, transform_indices = @transform_5, window_bounds = array<i64: 1, 32>}, {pipeline_mode = #tpu.pipeline_mode<synchronous>, transform_indices = @transform_6, window_bounds = array<i64: 2, 32>}, {pipeline_mode = #tpu.pipeline_mode<synchronous>, transform_indices = @transform_7, window_bounds = array<i64: 1, 32>}, {pipeline_mode = #tpu.pipeline_mode<synchronous>, transform_indices = @transform_8, window_bounds = array<i64: 1, 32>}, {pipeline_mode = #tpu.pipeline_mode<synchronous>, transform_indices = @transform_9, window_bounds = array<i64: 32, 32>}, {pipeline_mode = #tpu.pipeline_mode<synchronous>, transform_indices = @transform_10, window_bounds = array<i64: 1, 32>}, {pipeline_mode = #tpu.pipeline_mode<synchronous>, transform_indices = @transform_11, window_bounds = array<i64: 32, 128>}, {pipeline_mode = #tpu.pipeline_mode<synchronous>, transform_indices = @transform_12, window_bounds = array<i64: 1, 128>}, {transform_indices = @transform_13, window_bounds = array<i64: 8, 128>}]} {
    %c0 = arith.constant 0 : index
    %c0_0 = arith.constant 0 : index
    %0 = vector.load %arg1[%c0, %c0_0] : memref<8x16xf32, #tpu.memory_space<vmem>>, vector<8x16xf32>
    %c0_1 = arith.constant 0 : index
    %c0_2 = arith.constant 0 : index
    %1 = vector.load %arg2[%c0_1, %c0_2] : memref<8x1xf32, #tpu.memory_space<vmem>>, vector<8x1xf32>
    %2 = math.log %1 : vector<8x1xf32>
    %c0_3 = arith.constant 0 : index
    %c0_4 = arith.constant 0 : index
    %3 = vector.load %arg5[%c0_3, %c0_4] : memref<16x32xf32, #tpu.memory_space<vmem>>, vector<16x32xf32>
    %cst = arith.constant dense<0.000000e+00> : vector<8x32xf32>
    %4 = tpu.matmul %0, %3, %cst {dimension_numbers = #tpu.dot_dimension_numbers<[1], [0], [0], [1], [0, 0, 1, 1], [], []>} : vector<8x16xf32>, vector<16x32xf32>, vector<8x32xf32> -> vector<8x32xf32>
    %c0_5 = arith.constant 0 : index
    %c0_6 = arith.constant 0 : index
    %5 = vector.load %arg6[%c0_5, %c0_6] : memref<1x32xf32, #tpu.memory_space<vmem>>, vector<1x32xf32>
    %6 = vector.broadcast %2 : vector<8x1xf32> to vector<8x32xf32>
    %7 = vector.broadcast %5 : vector<1x32xf32> to vector<8x32xf32>
    %8 = arith.mulf %6, %7 : vector<8x32xf32>
    %9 = arith.addf %4, %8 : vector<8x32xf32>
    %c0_7 = arith.constant 0 : index
    %c0_8 = arith.constant 0 : index
    %10 = vector.load %arg3[%c0_7, %c0_8] : memref<8x2xf32, #tpu.memory_space<vmem>>, vector<8x2xf32>
    %c0_9 = arith.constant 0 : index
    %c0_10 = arith.constant 0 : index
    %11 = vector.load %arg7[%c0_9, %c0_10] : memref<2x32xf32, #tpu.memory_space<vmem>>, vector<2x32xf32>
    %12 = vector.extract_strided_slice %10 {offsets = [0, 0], sizes = [8, 1], strides = [1, 1]} : vector<8x2xf32> to vector<8x1xf32>
    %13 = vector.extract_strided_slice %11 {offsets = [0, 0], sizes = [1, 32], strides = [1, 1]} : vector<2x32xf32> to vector<1x32xf32>
    %14 = vector.broadcast %12 : vector<8x1xf32> to vector<8x32xf32>
    %15 = vector.broadcast %13 : vector<1x32xf32> to vector<8x32xf32>
    %16 = arith.mulf %14, %15 : vector<8x32xf32>
    %17 = arith.addf %9, %16 : vector<8x32xf32>
    %18 = vector.extract_strided_slice %10 {offsets = [0, 1], sizes = [8, 1], strides = [1, 1]} : vector<8x2xf32> to vector<8x1xf32>
    %19 = vector.extract_strided_slice %11 {offsets = [1, 0], sizes = [1, 32], strides = [1, 1]} : vector<2x32xf32> to vector<1x32xf32>
    %20 = vector.broadcast %18 : vector<8x1xf32> to vector<8x32xf32>
    %21 = vector.broadcast %19 : vector<1x32xf32> to vector<8x32xf32>
    %22 = arith.mulf %20, %21 : vector<8x32xf32>
    %23 = arith.addf %17, %22 : vector<8x32xf32>
    %c0_11 = arith.constant 0 : index
    %c0_12 = arith.constant 0 : index
    %24 = vector.load %arg4[%c0_11, %c0_12] : memref<8x1xf32, #tpu.memory_space<vmem>>, vector<8x1xf32>
    %c0_13 = arith.constant 0 : index
    %c0_14 = arith.constant 0 : index
    %25 = vector.load %arg8[%c0_13, %c0_14] : memref<1x32xf32, #tpu.memory_space<vmem>>, vector<1x32xf32>
    %26 = vector.broadcast %24 : vector<8x1xf32> to vector<8x32xf32>
    %27 = vector.broadcast %25 : vector<1x32xf32> to vector<8x32xf32>
    %28 = arith.mulf %26, %27 : vector<8x32xf32>
    %29 = arith.addf %23, %28 : vector<8x32xf32>
    %c0_15 = arith.constant 0 : index
    %c0_16 = arith.constant 0 : index
    %30 = vector.load %arg9[%c0_15, %c0_16] : memref<1x32xf32, #tpu.memory_space<vmem>>, vector<1x32xf32>
    %31 = vector.broadcast %30 : vector<1x32xf32> to vector<8x32xf32>
    %32 = arith.addf %29, %31 : vector<8x32xf32>
    %cst_17 = arith.constant 0.000000e+00 : f32
    %33 = vector.broadcast %cst_17 : f32 to vector<8x32xf32>
    %34 = arith.maximumf %32, %33 : vector<8x32xf32>
    %c0_18 = arith.constant 0 : index
    %c0_19 = arith.constant 0 : index
    %35 = vector.load %arg10[%c0_18, %c0_19] : memref<32x32xf32, #tpu.memory_space<vmem>>, vector<32x32xf32>
    %cst_20 = arith.constant dense<0.000000e+00> : vector<8x32xf32>
    %36 = tpu.matmul %34, %35, %cst_20 {dimension_numbers = #tpu.dot_dimension_numbers<[1], [0], [0], [1], [0, 0, 1, 1], [], []>} : vector<8x32xf32>, vector<32x32xf32>, vector<8x32xf32> -> vector<8x32xf32>
    %c0_21 = arith.constant 0 : index
    %c0_22 = arith.constant 0 : index
    %37 = vector.load %arg11[%c0_21, %c0_22] : memref<1x32xf32, #tpu.memory_space<vmem>>, vector<1x32xf32>
    %38 = vector.broadcast %37 : vector<1x32xf32> to vector<8x32xf32>
    %39 = arith.addf %36, %38 : vector<8x32xf32>
    %cst_23 = arith.constant 0.000000e+00 : f32
    %40 = vector.broadcast %cst_23 : f32 to vector<8x32xf32>
    %41 = arith.maximumf %39, %40 : vector<8x32xf32>
    %c0_24 = arith.constant 0 : index
    %c0_25 = arith.constant 0 : index
    %42 = vector.load %arg12[%c0_24, %c0_25] : memref<32x128xf32, #tpu.memory_space<vmem>>, vector<32x128xf32>
    %cst_26 = arith.constant dense<0.000000e+00> : vector<8x128xf32>
    %43 = tpu.matmul %41, %42, %cst_26 {dimension_numbers = #tpu.dot_dimension_numbers<[1], [0], [0], [1], [0, 0, 1, 1], [], []>} : vector<8x32xf32>, vector<32x128xf32>, vector<8x128xf32> -> vector<8x128xf32>
    %c0_27 = arith.constant 0 : index
    %c0_28 = arith.constant 0 : index
    %44 = vector.load %arg13[%c0_27, %c0_28] : memref<1x128xf32, #tpu.memory_space<vmem>>, vector<1x128xf32>
    %45 = vector.broadcast %44 : vector<1x128xf32> to vector<8x128xf32>
    %46 = arith.addf %43, %45 : vector<8x128xf32>
    %47 = tpu.iota {dimensions = array<i32: 1>} : vector<8x128xi32>
    %c4_i32 = arith.constant 4 : i32
    %48 = vector.broadcast %c4_i32 : i32 to vector<8x128xi32>
    %49 = arith.cmpi sge, %47, %48 : vector<8x128xi32>
    %c8_i32 = arith.constant 8 : i32
    %50 = vector.broadcast %c8_i32 : i32 to vector<8x128xi32>
    %51 = arith.cmpi slt, %47, %50 : vector<8x128xi32>
    %52 = arith.andi %49, %51 : vector<8x128xi1>
    %c9_i32 = arith.constant 9 : i32
    %53 = vector.broadcast %c9_i32 : i32 to vector<8x128xi32>
    %54 = arith.cmpi eq, %47, %53 : vector<8x128xi32>
    %55 = arith.ori %52, %54 : vector<8x128xi1>
    %cst_29 = arith.constant 0.000000e+00 : f32
    %56 = vector.broadcast %cst_29 : f32 to vector<8x128xf32>
    %57 = arith.maximumf %46, %56 : vector<8x128xf32>
    %58 = math.absf %46 : vector<8x128xf32>
    %cst_30 = arith.constant 0.000000e+00 : f32
    %59 = vector.broadcast %cst_30 : f32 to vector<8x128xf32>
    %60 = arith.subf %59, %58 : vector<8x128xf32>
    %61 = math.exp %60 : vector<8x128xf32>
    %62 = math.log1p %61 : vector<8x128xf32>
    %63 = arith.addf %57, %62 : vector<8x128xf32>
    %64 = arith.select %55, %63, %46 : vector<8x128xi1>, vector<8x128xf32>
    %c0_31 = arith.constant 0 : index
    %c0_32 = arith.constant 0 : index
    %65 = vector.load %arg14[%c0_31, %c0_32] : memref<8x128xf32, #tpu.memory_space<vmem>>, vector<8x128xf32>
    tpu.vector_store %arg14[%c0_31, %c0_32], %64 {strides = array<i32>} : memref<8x128xf32, #tpu.memory_space<vmem>>, vector<8x128xf32>,
    return
  }
  func.func @transform_0(%arg0: i32) -> (i32, i32) {
    %c0_i32 = arith.constant 0 : i32
    %c0_i32_0 = arith.constant 0 : i32
    return %arg0, %c0_i32 : i32, i32
  }
  func.func @transform_1(%arg0: i32) -> (i32, i32) {
    %c0_i32 = arith.constant 0 : i32
    %c0_i32_0 = arith.constant 0 : i32
    return %arg0, %c0_i32 : i32, i32
  }
  func.func @transform_2(%arg0: i32) -> (i32, i32) {
    %c0_i32 = arith.constant 0 : i32
    %c0_i32_0 = arith.constant 0 : i32
    return %arg0, %c0_i32 : i32, i32
  }
  func.func @transform_3(%arg0: i32) -> (i32, i32) {
    %c0_i32 = arith.constant 0 : i32
    %c0_i32_0 = arith.constant 0 : i32
    return %arg0, %c0_i32 : i32, i32
  }
  func.func @transform_4(%arg0: i32) -> (i32, i32) {
    %c0_i32 = arith.constant 0 : i32
    %c0_i32_0 = arith.constant 0 : i32
    %c0_i32_1 = arith.constant 0 : i32
    return %c0_i32, %c0_i32_0 : i32, i32
  }
  func.func @transform_5(%arg0: i32) -> (i32, i32) {
    %c0_i32 = arith.constant 0 : i32
    %c0_i32_0 = arith.constant 0 : i32
    %c0_i32_1 = arith.constant 0 : i32
    return %c0_i32, %c0_i32_0 : i32, i32
  }
  func.func @transform_6(%arg0: i32) -> (i32, i32) {
    %c0_i32 = arith.constant 0 : i32
    %c0_i32_0 = arith.constant 0 : i32
    %c0_i32_1 = arith.constant 0 : i32
    return %c0_i32, %c0_i32_0 : i32, i32
  }
  func.func @transform_7(%arg0: i32) -> (i32, i32) {
    %c0_i32 = arith.constant 0 : i32
    %c0_i32_0 = arith.constant 0 : i32
    %c0_i32_1 = arith.constant 0 : i32
    return %c0_i32, %c0_i32_0 : i32, i32
  }
  func.func @transform_8(%arg0: i32) -> (i32, i32) {
    %c0_i32 = arith.constant 0 : i32
    %c0_i32_0 = arith.constant 0 : i32
    %c0_i32_1 = arith.constant 0 : i32
    return %c0_i32, %c0_i32_0 : i32, i32
  }
  func.func @transform_9(%arg0: i32) -> (i32, i32) {
    %c0_i32 = arith.constant 0 : i32
    %c0_i32_0 = arith.constant 0 : i32
    %c0_i32_1 = arith.constant 0 : i32
    return %c0_i32, %c0_i32_0 : i32, i32
  }
  func.func @transform_10(%arg0: i32) -> (i32, i32) {
    %c0_i32 = arith.constant 0 : i32
    %c0_i32_0 = arith.constant 0 : i32
    %c0_i32_1 = arith.constant 0 : i32
    return %c0_i32, %c0_i32_0 : i32, i32
  }
  func.func @transform_11(%arg0: i32) -> (i32, i32) {
    %c0_i32 = arith.constant 0 : i32
    %c0_i32_0 = arith.constant 0 : i32
    %c0_i32_1 = arith.constant 0 : i32
    return %c0_i32, %c0_i32_0 : i32, i32
  }
  func.func @transform_12(%arg0: i32) -> (i32, i32) {
    %c0_i32 = arith.constant 0 : i32
    %c0_i32_0 = arith.constant 0 : i32
    %c0_i32_1 = arith.constant 0 : i32
    return %c0_i32, %c0_i32_0 : i32, i32
  }
  func.func @transform_13(%arg0: i32) -> (i32, i32) {
    %c0_i32 = arith.constant 0 : i32
    %c0_i32_0 = arith.constant 0 : i32
    return %arg0, %c0_i32 : i32, i32
  }
}

</mosaic_0001>

<bundles_post_ra>
// kernel: expression_encoder_forward.1
= control target key start
LH: loop header
LB: loop body
LE: loop exit
PB: predicated region body
PF: predicated region fallthrough
CT: control target
= control target key end

     0   :  { %s858_s25 = smov 0   ;;  %s939_s0 = inlined_call_operand.vmem [shape: f32[16,16], index: 0, kind: input, shape index: {}]   ;;  %s940_s1 = inlined_call_operand.vmem [shape: f32[16,1], index: 1, kind: input, shape index: {}]   ;;  %s941_s2 = inlined_call_operand.vmem [shape: f32[16,2], index: 2, kind: input, shape index: {}]   ;;  %s942_s3 = inlined_call_operand.vmem [shape: f32[16,1], index: 3, kind: input, shape index: {}]   ;;  %s943_s4 = inlined_call_operand.vmem [shape: f32[16,32], index: 4, kind: input, shape index: {}]   ;;  %s944_s5 = inlined_call_operand.vmem [shape: f32[1,32], index: 5, kind: input, shape index: {}]   ;;  %s945_s6 = inlined_call_operand.vmem [shape: f32[2,32], index: 6, kind: input, shape index: {}]   ;;  %s946_s7 = inlined_call_operand.vmem [shape: f32[1,32], index: 7, kind: input, shape index: {}]   ;;  %s947_s8 = inlined_call_operand.vmem [shape: f32[1,32], index: 8, kind: input, shape index: {}]   ;;  %s948_s9 = inlined_call_operand.vmem [shape: f32[32,32], index: 9, kind: input, shape index: {}]   ;;  %s949_s10 = inlined_call_operand.vmem [shape: f32[1,32], index: 10, kind: input, shape index: {}]   ;;  %s950_s11 = inlined_call_operand.vmem [shape: f32[32,128], index: 11, kind: input, shape index: {}]   ;;  %s951_s12 = inlined_call_operand.vmem [shape: f32[1,128], index: 12, kind: input, shape index: {}]   ;;  %s952_s13 = inlined_call_operand.vmem [shape: f32[16,128], index: 13, kind: output, shape index: {}]  }
   0x1 LB: > { %s739_s26 = sadd.s32 4294967295, %s784_s25   ;;  %p743_p0 = scmp.ge.s32.totalorder %s784_s25, 1  ;;  %s784_s25 = sphi %s858_s25, %s23_s25  }
   0x2   : > { %p413_p1 = scmp.lt.s32.totalorder %s784_s25, 3 }
   0x4   : > { %p414_p2 = pnand %p743_p0, %p413_p1 }
   0x5   : > { %p467_p3 = scmp.lt.s32.totalorder (!%p414_p2), %s739_s26, 1 }
   0x6   : > { %417 = sbr.rel (%p414_p2) target bundleno = 453 (0x1c5), region = 72 }
   0xb   : > { %v492_v0 = vld [vmem:[%s943_s4 + $0x8] sm:$0xff]  ;;  %v491_v1 = vld [vmem:[%s943_s4] sm:$0xff]  ;;  %v786_v2 = vmov 0   ;;  %s954_s26 = smov (!%p467_p3, %s739_s26), 1  ;;  %v787_v3 = vmov 1   ;;  %vm503_vm0 = vcmask 130048   ;;  %v626_v49 = vlaneseq }
   0xc   : > { %521 = vmatpush.msra.mxu0 %v492_v0  ;;  %764 = vset.pattern.permute.xlu0 %v786_v2  ;;  %s872_s14 = sshll.u32 %s954_s26, 3  ;;  %v565_v10 = vld [vmem:[%s948_s9 + $0x18] sm:$0xff]  ;;  %v564_v11 = vld [vmem:[%s948_s9 + $0x10] sm:$0xff]  ;;  %v563_v12 = vld [vmem:[%s948_s9 + $0x8] sm:$0xff]  ;;  %vm570_vm1 = vcmask 261120  }
   0xd   : > { %765 = vset.pattern.permute.xlu1 %v787_v3  ;;  %s470_s17 = scalar_lea.vmem %s939_s0, %s872_s14  ;;  %s474_s20 = scalar_lea.vmem %s940_s1, %s872_s14  ;;  %586 = vmatpush.msra.mxu1 %v565_v10  ;;  %v562_v13 = vld [vmem:[%s948_s9] sm:$0xff]  ;;  %v598_v14 = vld [vmem:[%s950_s11 + $0x18] sm:$0xff]  ;;  %v597_v36 = vld [vmem:[%s950_s11 + $0x10] sm:$0xff]  ;;  %v627_v52 = vand.u32 127, %v626_v49 }
   0xe   : > { %522 = vmatpush.msra.mxu0 %v491_v1  ;;  %v487_v4 = vld [vmem:[%s470_s17] sm:$0xff]  ;;  %s478_s23 = scalar_lea.vmem %s941_s2, %s872_s14  ;;  %s482_s27 = scalar_lea.vmem %s942_s3, %s872_s14  ;;  %618 = vmatpush.msra.mxu2 %v598_v14  ;;  %v596_v37 = vld [vmem:[%s950_s11 + $0x8] sm:$0xff] }
   0xf   : > { %v488_v5 = vld [vmem:[%s474_s20] sm:$0xff]  ;;  %749 = vmatmul.msk.f32.vlgmr.msra.gmra.mxu0 %vm503_vm0, %v487_v4  ;;  %587 = vmatpush.msra.mxu1 %v564_v11  ;;  %vm628_vm2 = vcmp.ge.s32.totalorder %v627_v52, 4  ;;  %vm629_vm3 = vcmp.lt.s32.totalorder %v627_v52, 8  ;;  %vm631_vm5 = vcmp.eq.s32.totalorder %v627_v52, 9  ;;  %s486_s28 = scalar_lea.vmem %s952_s13, %s872_s14 }
  0x10   : > { %772 = vlog2.f32 %v488_v5  ;;  %v527_v6 = vld [vmem:[%s478_s23] sm:$0xff]  ;;  %619 = vmatpush.msra.mxu2 %v597_v36  ;;  %vm630_vm4 = vmand %vm628_vm2, %vm629_vm3 }
  0x11   : > { %538 = vperm.xlu1 %765, %v527_v6   ;;  %v544_v9 = vld [vmem:[%s482_s27] sm:$0xff]  ;;  %588 = vmatpush.msra.mxu1 %v563_v12  ;;  %vm632_vm7 = vmor %vm630_vm4, %vm631_vm5 }
  0x12   : > { %v767_v17 = vld [vmem:[%s944_s5] ss:$0 sm:$0xff]  ;;  %620 = vmatpush.msra.mxu2 %v596_v37 }
  0x13   : > { %589 = vmatpush.msra.mxu1 %v562_v13  ;;  %v528_v18 = vld [vmem:[%s945_s6] sm:$0x3] }
  0x14   : > { %v534_v20 = vperm.slane %v528_v18, 0  ;;  %v541_v22 = vperm.slane %v528_v18, 1  ;;  %v768_v23 = vld [vmem:[%s946_s7] ss:$0 sm:$0xff] }
  0x15   : > { %v769_v32 = vld [vmem:[%s947_s8] ss:$0 sm:$0xff] }
  0x16   : > { %v773_v7 = vpop.eup %772  ;;  %v595_v38 = vld [vmem:[%s950_s11] sm:$0xff] }
  0x17   : > { %v490_v8 = vmul.f32 0.6931472, %v773_v7  ;;  %621 = vmatpush.msra.mxu2 %v595_v38  ;;  %v770_v39 = vld [vmem:[%s949_s10] ss:$0 sm:$0xff] }
  0x18   : > { %v771_v43 = vld [vmem:[%s951_s12] ss:$0 sm:$0xff] }
  0x19   : > { %496 = vperm.xlu0 %764, %v490_v8   ;;  %766 = vset.pattern.permute.xlu1 %v786_v2 }
  0x1a   : > { %548 = vperm.xlu1 %766, %v544_v9  }
  0x21   : > { %531 = vperm.xlu0 %764, %v527_v6  }
  0x83   : > { %v539_v15 = vpop.permute.xlu1 %538 }
  0x84   : > { %v542_v28 = vmul.f32 %v541_v22, %v539_v15 }
  0x8b   : > { %v497_v16 = vpop.permute.xlu0 %496 }
  0x8c   : > { %v502_v19 = vmul.f32 %v767_v17, %v497_v16  ;;  %v524_v21 = vpop.f32.mrf.mxu0  ;;  %v549_v25 = vpop.permute.xlu1 %548 }
  0x8d   : > { %v554_v30 = vmul.f32 %v768_v23, %v549_v25 }
  0x8e   : > { %v525_v26 = vadd.f32 %v524_v21, %v502_v19 }
  0x93   : > { %v532_v24 = vpop.permute.xlu0 %531 }
  0x94   : > { %v535_v27 = vmul.f32 %v534_v20, %v532_v24 }
  0x96   : > { %v536_v29 = vadd.f32 %v535_v27, %v525_v26 }
  0x98   : > { %v543_v31 = vadd.f32 %v542_v28, %v536_v29 }
  0x9a   : > { %v555_v33 = vadd.f32 %v554_v30, %v543_v31 }
  0x9c   : > { %v560_v34 = vadd.f32 %v769_v32, %v555_v33 }
  0x9e   : > { %v561_v35 = vmax.f32 %v560_v34, 0.0 }
  0xa0   : > { %750 = vmatmul.msk.f32.vlgmr.msra.gmra.mxu1 %vm570_vm1, %v561_v35 }
 0x11d   : > { %v591_v40 = vpop.f32.mrf.mxu1 }
 0x11e   : > { %v592_v41 = vadd.f32 %v770_v39, %v591_v40 }
 0x120   : > { %v594_v42 = vmax.f32 %v592_v41, 0.0 }
 0x122   : > { %751 = vmatmul.msk.f32.vlgmr.msra.gmra.mxu2 %vm570_vm1, %v594_v42 }
 0x1a5   : > { %v623_v44 = vpop.f32.mrf.mxu2 }
 0x1a6   : > { %v624_v45 = vadd.f32 %v771_v43, %v623_v44 }
 0x1a8   : > { %v634_v46 = vand.u32 2147483647, %v624_v45  ;;  %v633_v59 = vmax.f32 %v624_v45, 0.0 }
 0x1aa   : > { %v635_v47 = vsub.f32 0.0, %v634_v46 }
 0x1ac   : > { %v636_v48 = vmul.f32 1.442695, %v635_v47 }
 0x1ae   : > { %774 = vpow2.f32 %v636_v48 }
 0x1b4   : > { %v775_v50 = vpop.eup %774 }
 0x1b5   : > { %v638_v51 = vadd.f32 1.0, %v775_v50  ;;  %v641_v53 = vmul.f32 -0.5, %v775_v50  ;;  %v644_v55 = vand.u32 2147483647, %v775_v50 }
 0x1b7   : > { %776 = vlog2.f32 %v638_v51  ;;  %v642_v54 = vadd.f32 1.0, %v641_v53  ;;  %vm645_vm6 = vcmp.lt.f32.partialorder %v644_v55, 0.0004427343 }
 0x1b9   : > { %v643_v58 = vmul.f32 %v775_v50, %v642_v54 }
 0x1bd   : > { %v777_v56 = vpop.eup %776 }
 0x1be   : > { %v640_v57 = vmul.f32 0.6931472, %v777_v56 }
 0x1c0   : > { %v646_v60 = vsel %vm645_vm6, %v643_v58, %v640_v57 }
 0x1c1   : > { %v647_v61 = vadd.f32 %v646_v60, %v633_v59 }
 0x1c3   : > { %v648_v62 = vsel %vm632_vm7, %v647_v61, %v624_v45 }
 0x1c4   : > { %649 = vst [vmem:[%s486_s28] sm:$0xff] %v648_v62 }
 0x1c5 PF: > { %s23_s25 = sadd.s32 1, %s784_s25  }
 0x1c6   : > { %p20_p4 = scmp.ge.s32.totalorder %s23_s25, 4  }
 0x1c8   :  { %22 = sbr.rel (!%p20_p4) target bundleno = 1 (0x1), region = 111 }

</bundles_post_ra>
